<compile_context>
chip_gen: v7x
topology: tpu7x:2x2x1
jax: 0.10.0
libtpu: 0.0.40
codegen_flags: <defaults>
</compile_context>

<pallas_src>
import functools

import jax
import jax.numpy as jnp
from jax.experimental import pallas as pl
from jax.experimental.pallas import tpu as pltpu

LANE = 128
_EPS = 1e-5


def _round_up(x, m):
    return (x + m - 1) // m * m


def _cdiv(a, b):
    return -(-a // b)


# -----------------------------------------------------------------------------
# Pallas kernels
# -----------------------------------------------------------------------------
def _conv_stats_kernel(taps_ref, w_ref, y_ref, stats_ref):
    # taps_ref : (tile_P, KCpad) bf16   lane-dense im2col rows
    # w_ref    : (KCpad, Cpad)  bf16
    # y_ref    : (tile_P, Cpad) bf16    pre-BN conv output (written once, consumed by pass 2)
    # stats_ref: (8, Cpad) f32          row 0 = per-channel sum, row 1 = per-channel sum-of-squares
    y = jnp.dot(taps_ref[...], w_ref[...], preferred_element_type=jnp.float32)
    y_ref[...] = y.astype(y_ref.dtype)
    s1 = jnp.sum(y, axis=0, keepdims=True)
    s2 = jnp.sum(y * y, axis=0, keepdims=True)
    stats_ref[...] = jnp.concatenate(
        [s1, s2, jnp.zeros((6, y.shape[1]), jnp.float32)], axis=0)


def _bn_apply_kernel(y_ref, scale_ref, shift_ref, o_ref, *, apply_relu):
    # Pure elementwise pass: folded BN is one FMA per element.
    out = y_ref[...].astype(jnp.float32) * scale_ref[...] + shift_ref[...]
    if apply_relu:
        out = jnp.maximum(out, 0.0)
    o_ref[...] = out.astype(o_ref.dtype)


def _bn_apply_residual_kernel(y_ref, scale_ref, shift_ref,
                              res_ref, rscale_ref, rshift_ref, o_ref, *, apply_relu):
    # conv2 BN + (downsample BN OR identity) residual add + ReLU, all fused elementwise.
    out = y_ref[...].astype(jnp.float32) * scale_ref[...] + shift_ref[...]
    out = out + (res_ref[...].astype(jnp.float32) * rscale_ref[...] + rshift_ref[...])
    if apply_relu:
        out = jnp.maximum(out, 0.0)
    o_ref[...] = out.astype(o_ref.dtype)


# -----------------------------------------------------------------------------
# pallas_call wrappers
# -----------------------------------------------------------------------------
def _compiler_params(vmem_limit_bytes):
    return pltpu.CompilerParams(
        dimension_semantics=("parallel",),       # P tiles are independent (2 TCs on v7x)
        vmem_limit_bytes=int(vmem_limit_bytes),
    )


def conv_stats_pallas(taps, w, tile_rows, vmem_limit):
    p_pad, kc = taps.shape
    c_pad = w.shape[1]
    nt = p_pad // tile_rows
    y, stats = pl.pallas_call(
        _conv_stats_kernel,
        out_shape=(jax.ShapeDtypeStruct((p_pad, c_pad), jnp.bfloat16),
                   jax.ShapeDtypeStruct((nt * 8, c_pad), jnp.float32)),
        grid=(nt,),
        in_specs=[
            pl.BlockSpec((tile_rows, kc), lambda i: (i, 0)),
            pl.BlockSpec((kc, c_pad), lambda i: (0, 0)),   # grid-invariant weights
        ],
        out_specs=(
            pl.BlockSpec((tile_rows, c_pad), lambda i: (i, 0)),
            pl.BlockSpec((8, c_pad), lambda i: (i, 0)),
        ),
        compiler_params=_compiler_params(vmem_limit),
    )(taps, w)
    return y, stats


def bn_apply_pallas(y, scale, shift, tile_rows, vmem_limit, *, apply_relu, out_dtype):
    p_pad, c_pad = y.shape
    nt = p_pad // tile_rows
    kernel = functools.partial(_bn_apply_kernel, apply_relu=apply_relu)
    return pl.pallas_call(
        kernel,
        out_shape=jax.ShapeDtypeStruct((p_pad, c_pad), out_dtype),
        grid=(nt,),
        in_specs=[
            pl.BlockSpec((tile_rows, c_pad), lambda i: (i, 0)),
            pl.BlockSpec((1, c_pad), lambda i: (0, 0)),
            pl.BlockSpec((1, c_pad), lambda i: (0, 0)),
        ],
        out_specs=pl.BlockSpec((tile_rows, c_pad), lambda i: (i, 0)),
        compiler_params=_compiler_params(vmem_limit),
    )(y, scale, shift)


def bn_apply_residual_pallas(y, scale, shift, res, rscale, rshift,
                             tile_rows, vmem_limit, *, apply_relu, out_dtype):
    p_pad, c_pad = y.shape
    nt = p_pad // tile_rows
    kernel = functools.partial(_bn_apply_residual_kernel, apply_relu=apply_relu)
    return pl.pallas_call(
        kernel,
        out_shape=jax.ShapeDtypeStruct((p_pad, c_pad), out_dtype),
        grid=(nt,),
        in_specs=[
            pl.BlockSpec((tile_rows, c_pad), lambda i: (i, 0)),
            pl.BlockSpec((1, c_pad), lambda i: (0, 0)),
            pl.BlockSpec((1, c_pad), lambda i: (0, 0)),
            pl.BlockSpec((tile_rows, c_pad), lambda i: (i, 0)),
            pl.BlockSpec((1, c_pad), lambda i: (0, 0)),
            pl.BlockSpec((1, c_pad), lambda i: (0, 0)),
        ],
        out_specs=pl.BlockSpec((tile_rows, c_pad), lambda i: (i, 0)),
        compiler_params=_compiler_params(vmem_limit),
    )(y, scale, shift, res, rscale, rshift)


# -----------------------------------------------------------------------------
# Tiling / VMEM budgeting
# -----------------------------------------------------------------------------
def _vmem_capacity_bytes():
    try:
        return int(pltpu.get_tpu_info().vmem_capacity_bytes)
    except Exception:
        return 64 * 1024 * 1024     # conservative (v7x per-TC)


def _choose_tiling(P, kc_pad_max, c_pad):
    cap = _vmem_capacity_bytes()
    vmem_limit = min(cap // 2, 64 * 1024 * 1024)     # 64 MiB on v5e/v6e, 32 MiB on v7x
    hard_cap = 2048 if vmem_limit > 32 * 1024 * 1024 else 1024
    # Conservative per-row VMEM bytes across both passes (double-buffered operands):
    #   stats pass: taps bf16 x2 + y bf16 x2 ; apply pass: y bf16 x2 + res bf16 x2 + out f32 x2.
    row_bytes = 4 * kc_pad_max + 16 * c_pad
    weight_bytes = 2 * kc_pad_max * c_pad * 2 + (2 << 20)   # double-buffered bf16 weights + slack
    budget = max(vmem_limit - weight_bytes, 1 << 20)
    max_tile = max(16, min(hard_cap, (budget // row_bytes) // 16 * 16))
    nt = _cdiv(P, max_tile)
    tile = _round_up(_cdiv(P, nt), 16)   # pad waste < 16 rows per tile instead of up to a tile
    return tile, nt * tile, vmem_limit


# -----------------------------------------------------------------------------
# Plain-JAX glue: lane-dense im2col + weight relayout (all bf16, single fused pad)
# -----------------------------------------------------------------------------
def _conv_out(d, ksize, stride, padding):
    return (d + 2 * padding - ksize) // stride + 1


def _im2taps(x, ksize, stride, padding, p_pad, kc_pad):
    # x: (N, D, H, W, C) bf16 -> (p_pad, kc_pad) bf16, tap-major / channel-minor rows.
    N, D, H, W, C = x.shape
    if padding:
        x = jnp.pad(x, ((0, 0), (padding, padding), (padding, padding),
                        (padding, padding), (0, 0)))
    Do = _conv_out(D, ksize, stride, padding)
    Ho = _conv_out(H, ksize, stride, padding)
    Wo = _conv_out(W, ksize, stride, padding)
    P = N * Do * Ho * Wo
    cols = []
    for kd in range(ksize):
        for kh in range(ksize):
            for kw in range(ksize):
                sl = x[:, kd:kd + stride * (Do - 1) + 1:stride,
                          kh:kh + stride * (Ho - 1) + 1:stride,
                          kw:kw + stride * (Wo - 1) + 1:stride, :]
                cols.append(sl.reshape(P, C))
    taps = jnp.concatenate(cols, axis=-1)
    taps = jnp.pad(taps, ((0, p_pad - P), (0, kc_pad - taps.shape[1])))
    return taps, (N, Do, Ho, Wo)


def _prep_w(w, kc_pad, c_pad):
    # torch Conv3d weight (Cout, Cin, kd, kh, kw) -> (kd*kh*kw*Cin, Cout) (matches tap order)
    cout, cin, kd, kh, kw = w.shape
    wf = jnp.transpose(w, (2, 3, 4, 1, 0)).reshape(kd * kh * kw * cin, cout)
    return jnp.pad(wf, ((0, kc_pad - wf.shape[0]), (0, c_pad - wf.shape[1]))).astype(jnp.bfloat16)


def _bn_fold(stats, gamma, beta, n_rows, c_out, c_pad):
    # stats: (nt*8, c_pad); rows 0/1 of each 8-row group hold a tile's sum / sumsq.
    # NOTE: padded (zero) rows contribute nothing to sum/sumsq and the division is by the TRUE
    #       row count n_rows, so p_pad padding does not bias the statistics.
    # NOTE: single-pass E[x^2]-E[x]^2 can cancel if |mean| >> std; acceptable for this block.
    st = stats.reshape(-1, 8, c_pad)
    total = jnp.sum(st[:, 0, :], axis=0)
    total_sq = jnp.sum(st[:, 1, :], axis=0)
    mean = total / n_rows
    var = jnp.maximum(total_sq / n_rows - mean * mean, 0.0)
    inv = jax.lax.rsqrt(var + _EPS)
    g = jnp.pad(gamma.astype(jnp.float32), (0, c_pad - c_out))
    b = jnp.pad(beta.astype(jnp.float32), (0, c_pad - c_out))
    scale = g * inv
    shift = b - mean * scale
    return scale.reshape(1, c_pad), shift.reshape(1, c_pad)


# -----------------------------------------------------------------------------
# ResidualBlock3D forward (Pallas)
# -----------------------------------------------------------------------------
@functools.partial(jax.jit, static_argnums=(2,))
def residual_block_3d(x_ncdhw, params, stride):
    # NCDHW -> NDHWC, cast to bf16 BEFORE im2col so the 27x-expanded taps are built in bf16.
    x = jnp.transpose(x_ncdhw, (0, 2, 3, 4, 1)).astype(jnp.bfloat16)
    N, D, H, W, Cin = x.shape
    Cout = params["w1"].shape[0]
    c_pad = _round_up(Cout, LANE)
    kc1_pad = _round_up(27 * Cin, LANE)
    kc2_pad = _round_up(27 * Cout, LANE)
    kcd_pad = _round_up(Cin, LANE)

    Do = _conv_out(D, 3, stride, 1)
    Ho = _conv_out(H, 3, stride, 1)
    Wo = _conv_out(W, 3, stride, 1)
    P = N * Do * Ho * Wo                    # shared output-position count for all three convs
    tile, p_pad, vmem_limit = _choose_tiling(P, max(kc1_pad, kc2_pad), c_pad)
    assert p_pad >= P and p_pad % tile == 0

    # NOTE: conv biases (b1/b2/b_ds) are intentionally not applied: a per-channel constant is
    #       exactly cancelled by training-mode BN's mean subtraction (NOT valid for eval-mode
    #       running stats).

    # --- conv1 (3x3x3, stride) + bn1 + relu ---------------------------------
    t1, _ = _im2taps(x, 3, stride, 1, p_pad, kc1_pad)
    w1 = _prep_w(params["w1"], kc1_pad, c_pad)
    y1, st1 = conv_stats_pallas(t1, w1, tile, vmem_limit)
    sc1, sh1 = _bn_fold(st1, params["gamma1"], params["beta1"], P, Cout, c_pad)
    h = bn_apply_pallas(y1, sc1, sh1, tile, vmem_limit,
                        apply_relu=True, out_dtype=jnp.bfloat16)

    # --- identity / downsample path (pre-BN conv output only; BN fused into conv2 apply) ---
    if stride != 1 or Cin != Cout:
        td, _ = _im2taps(x, 1, stride, 0, p_pad, kcd_pad)
        wd = _prep_w(params["w_ds"], kcd_pad, c_pad)
        res, std = conv_stats_pallas(td, wd, tile, vmem_limit)      # res: pre-BN, bf16
        rsc, rsh = _bn_fold(std, params["gamma_ds"], params["beta_ds"], P, Cout, c_pad)
    else:
        res = jnp.pad(x.reshape(P, Cin), ((0, p_pad - P), (0, c_pad - Cin)))
        rsc = jnp.ones((1, c_pad), jnp.float32)
        rsh = jnp.zeros((1, c_pad), jnp.float32)

    # --- conv2 (3x3x3, stride 1) + bn2 + residual add + relu ----------------
    h_sp = h[:P, :Cout].reshape(N, Do, Ho, Wo, Cout)
    t2, _ = _im2taps(h_sp, 3, 1, 1, p_pad, kc2_pad)
    w2 = _prep_w(params["w2"], kc2_pad, c_pad)
    y2, st2 = conv_stats_pallas(t2, w2, tile, vmem_limit)
    sc2, sh2 = _bn_fold(st2, params["gamma2"], params["beta2"], P, Cout, c_pad)
    out = bn_apply_residual_pallas(y2, sc2, sh2, res, rsc, rsh, tile, vmem_limit,
                                   apply_relu=True, out_dtype=jnp.float32)

    out = out[:P, :Cout].reshape(N, Do, Ho, Wo, Cout)
    return jnp.transpose(out, (0, 4, 1, 2, 3))  # NDHWC -> NCDHW


# -----------------------------------------------------------------------------
# Pure-JAX f32 reference (with conv bias, to prove the bias/BN fold)
# -----------------------------------------------------------------------------
def _conv3d_ref(x, w, b, stride, padding):
    w_dhwio = jnp.transpose(w, (2, 3, 4, 1, 0))
    y = jax.lax.conv_general_dilated(
        x, w_dhwio, window_strides=(stride,) * 3,
        padding=[(padding, padding)] * 3,
        dimension_numbers=("NDHWC", "DHWIO", "NDHWC"))
    return y + b.reshape(1, 1, 1, 1, -1)


def _bn_train_ref(y, gamma, beta, eps=_EPS):
    mean = jnp.mean(y, axis=(0, 1, 2, 3), keepdims=True)
    var = jnp.mean((y - mean) ** 2, axis=(0, 1, 2, 3), keepdims=True)
    return (y - mean) / jnp.sqrt(var + eps) * gamma.reshape(1, 1, 1, 1, -1) \
        + beta.reshape(1, 1, 1, 1, -1)


def residual_block_3d_ref(x_ncdhw, params, stride):
    x = jnp.transpose(x_ncdhw, (0, 2, 3, 4, 1)).astype(jnp.float32)
    Cin = x.shape[-1]
    Cout = params["w1"].shape[0]
    h = jax.nn.relu(_bn_train_ref(_conv3d_ref(x, params["w1"], params["b1"], stride, 1),
                                  params["gamma1"], params["beta1"]))
    out = _bn_train_ref(_conv3d_ref(h, params["w2"], params["b2"], 1, 1),
                        params["gamma2"], params["beta2"])
    if stride != 1 or Cin != Cout:
        ident = _bn_train_ref(_conv3d_ref(x, params["w_ds"], params["b_ds"], stride, 0),
                              params["gamma_ds"], params["beta_ds"])
    else:
        ident = x
    out = jax.nn.relu(out + ident)
    return jnp.transpose(out, (0, 4, 1, 2, 3))


# -----------------------------------------------------------------------------
def init_params(key, cin, cout, stride):
    ks = jax.random.split(key, 12)
    p = {
        "w1": 0.1 * jax.random.normal(ks[0], (cout, cin, 3, 3, 3), jnp.float32),
        "b1": 0.05 * jax.random.normal(ks[1], (cout,), jnp.float32),
        "gamma1": 1.0 + 0.1 * jax.random.normal(ks[2], (cout,), jnp.float32),
        "beta1": 0.05 * jax.random.normal(ks[3], (cout,), jnp.float32),
        "w2": 0.1 * jax.random.normal(ks[4], (cout, cout, 3, 3, 3), jnp.float32),
        "b2": 0.05 * jax.random.normal(ks[5], (cout,), jnp.float32),
        "gamma2": 1.0 + 0.1 * jax.random.normal(ks[6], (cout,), jnp.float32),
        "beta2": 0.05 * jax.random.normal(ks[7], (cout,), jnp.float32),
    }
    if stride != 1 or cin != cout:
        p["w_ds"] = 0.1 * jax.random.normal(ks[8], (cout, cin, 1, 1, 1), jnp.float32),
        # (fix accidental tuple)
        p["w_ds"] = p["w_ds"][0]
        p["b_ds"] = 0.05 * jax.random.normal(ks[9], (cout,), jnp.float32)
        p["gamma_ds"] = 1.0 + 0.1 * jax.random.normal(ks[10], (cout,), jnp.float32)
        p["beta_ds"] = 0.05 * jax.random.normal(ks[11], (cout,), jnp.float32)
    return p


if __name__ == "__main__":
    key = jax.random.PRNGKey(0)
    # (N, Cin, Cout, D, H, W, stride): exercise both the downsample and the identity paths.
    configs = [
        (2, 4, 8, 8, 8, 8, 2),
        (2, 8, 8, 8, 8, 8, 1),
    ]
    for (N, Cin, Cout, D, H, W, stride) in configs:
        kx, kp, key = jax.random.split(key, 3)
        x = jax.random.normal(kx, (N, Cin, D, H, W), jnp.float32)   # PyTorch NCDHW input
        params = init_params(kp, Cin, Cout, stride)

        y = jax.block_until_ready(residual_block_3d(x, params, stride))
        y_ref = residual_block_3d_ref(x, params, stride)
        assert y.shape == y_ref.shape, (y.shape, y_ref.shape)
        max_err = float(jnp.max(jnp.abs(y - y_ref)))
        # bf16 MXU operands + bf16 pre-BN intermediates -> expect ~1e-2-scale error vs the f32
        # reference; a layout / semantics bug would be O(1).
        if max_err > 1e-1:
            raise AssertionError(
                f"Pallas output mismatch vs reference (stride={stride}), max abs err = {max_err}")

    print("KERNEL_OK")
</pallas_src>

<mosaic_0001>
module attributes {stable_mosaic.version = 11 : i64} {
  func.func @_conv_stats_kernel(%arg0: i32, %arg1: memref<128x128xbf16, #tpu.memory_space<vmem>>, %arg2: memref<128x128xbf16, #tpu.memory_space<vmem>>, %arg3: memref<128x128xbf16, #tpu.memory_space<vmem>>, %arg4: memref<8x128xf32, #tpu.memory_space<vmem>>) attributes {dimension_semantics = [#tpu.dimension_semantics<parallel>], iteration_bounds = array<i64: 1>, scalar_prefetch = 0 : i64, scratch_operands = 0 : i64, tpu.core_type = #tpu.core_type<tc>, window_params = [{transform_indices = @transform_0, window_bounds = array<i64: 128, 128>}, {pipeline_mode = #tpu.pipeline_mode<synchronous>, transform_indices = @transform_1, window_bounds = array<i64: 128, 128>}, {transform_indices = @transform_2, window_bounds = array<i64: 128, 128>}, {transform_indices = @transform_3, window_bounds = array<i64: 8, 128>}]} {
    %c0 = arith.constant 0 : index
    %c0_0 = arith.constant 0 : index
    %0 = vector.load %arg1[%c0, %c0_0] : memref<128x128xbf16, #tpu.memory_space<vmem>>, vector<128x128xbf16>
    %c0_1 = arith.constant 0 : index
    %c0_2 = arith.constant 0 : index
    %1 = vector.load %arg2[%c0_1, %c0_2] : memref<128x128xbf16, #tpu.memory_space<vmem>>, vector<128x128xbf16>
    %cst = arith.constant dense<0.000000e+00> : vector<128x128xf32>
    %2 = tpu.matmul %0, %1, %cst {dimension_numbers = #tpu.dot_dimension_numbers<[1], [0], [0], [1], [0, 0, 1, 1], [], []>} : vector<128x128xbf16>, vector<128x128xbf16>, vector<128x128xf32> -> vector<128x128xf32>
    %3 = arith.truncf %2 : vector<128x128xf32> to vector<128x128xbf16>
    %c0_3 = arith.constant 0 : index
    %c0_4 = arith.constant 0 : index
    %4 = vector.load %arg3[%c0_3, %c0_4] : memref<128x128xbf16, #tpu.memory_space<vmem>>, vector<128x128xbf16>
    tpu.vector_store %arg3[%c0_3, %c0_4], %3 {strides = array<i32>} : memref<128x128xbf16, #tpu.memory_space<vmem>>, vector<128x128xbf16>,
    %cst_5 = arith.constant dense<0.000000e+00> : vector<128xf32>
    %5 = vector.multi_reduction <add>, %2, %cst_5 [0] : vector<128x128xf32> to vector<128xf32>
    %6 = vector.shape_cast %5 : vector<128xf32> to vector<1x128xf32>
    %7 = arith.mulf %2, %2 : vector<128x128xf32>
    %cst_6 = arith.constant dense<0.000000e+00> : vector<128xf32>
    %8 = vector.multi_reduction <add>, %7, %cst_6 [0] : vector<128x128xf32> to vector<128xf32>
    %9 = vector.shape_cast %8 : vector<128xf32> to vector<1x128xf32>
    %cst_7 = arith.constant 0.000000e+00 : f32
    %10 = vector.broadcast %cst_7 : f32 to vector<6x128xf32>
    %11 = tpu.concatenate %6, %9, %10 in 0 : vector<1x128xf32>, vector<1x128xf32>, vector<6x128xf32> -> vector<8x128xf32>
    %c0_8 = arith.constant 0 : index
    %c0_9 = arith.constant 0 : index
    %12 = vector.load %arg4[%c0_8, %c0_9] : memref<8x128xf32, #tpu.memory_space<vmem>>, vector<8x128xf32>
    tpu.vector_store %arg4[%c0_8, %c0_9], %11 {strides = array<i32>} : memref<8x128xf32, #tpu.memory_space<vmem>>, vector<8x128xf32>,
    return
  }
  func.func @transform_0(%arg0: i32) -> (i32, i32) {
    %c0_i32 = arith.constant 0 : i32
    %c0_i32_0 = arith.constant 0 : i32
    return %arg0, %c0_i32 : i32, i32
  }
  func.func @transform_1(%arg0: i32) -> (i32, i32) {
    %c0_i32 = arith.constant 0 : i32
    %c0_i32_0 = arith.constant 0 : i32
    %c0_i32_1 = arith.constant 0 : i32
    return %c0_i32, %c0_i32_0 : i32, i32
  }
  func.func @transform_2(%arg0: i32) -> (i32, i32) {
    %c0_i32 = arith.constant 0 : i32
    %c0_i32_0 = arith.constant 0 : i32
    return %arg0, %c0_i32 : i32, i32
  }
  func.func @transform_3(%arg0: i32) -> (i32, i32) {
    %c0_i32 = arith.constant 0 : i32
    %c0_i32_0 = arith.constant 0 : i32
    return %arg0, %c0_i32 : i32, i32
  }
}

module attributes {stable_mosaic.version = 11 : i64} {
  func.func @_bn_apply_kernel(%arg0: i32, %arg1: memref<128x128xbf16, #tpu.memory_space<vmem>>, %arg2: memref<1x128xf32, #tpu.memory_space<vmem>>, %arg3: memref<1x128xf32, #tpu.memory_space<vmem>>, %arg4: memref<128x128xbf16, #tpu.memory_space<vmem>>) attributes {dimension_semantics = [#tpu.dimension_semantics<parallel>], iteration_bounds = array<i64: 1>, scalar_prefetch = 0 : i64, scratch_operands = 0 : i64, tpu.core_type = #tpu.core_type<tc>, window_params = [{transform_indices = @transform_0, window_bounds = array<i64: 128, 128>}, {pipeline_mode = #tpu.pipeline_mode<synchronous>, transform_indices = @transform_1, window_bounds = array<i64: 1, 128>}, {pipeline_mode = #tpu.pipeline_mode<synchronous>, transform_indices = @transform_2, window_bounds = array<i64: 1, 128>}, {transform_indices = @transform_3, window_bounds = array<i64: 128, 128>}]} {
    %c0 = arith.constant 0 : index
    %c0_0 = arith.constant 0 : index
    %0 = vector.load %arg1[%c0, %c0_0] : memref<128x128xbf16, #tpu.memory_space<vmem>>, vector<128x128xbf16>
    %1 = arith.extf %0 : vector<128x128xbf16> to vector<128x128xf32>
    %c0_1 = arith.constant 0 : index
    %c0_2 = arith.constant 0 : index
    %2 = vector.load %arg2[%c0_1, %c0_2] : memref<1x128xf32, #tpu.memory_space<vmem>>, vector<1x128xf32>
    %3 = vector.broadcast %2 : vector<1x128xf32> to vector<128x128xf32>
    %4 = arith.mulf %1, %3 : vector<128x128xf32>
    %c0_3 = arith.constant 0 : index
    %c0_4 = arith.constant 0 : index
    %5 = vector.load %arg3[%c0_3, %c0_4] : memref<1x128xf32, #tpu.memory_space<vmem>>, vector<1x128xf32>
    %6 = vector.broadcast %5 : vector<1x128xf32> to vector<128x128xf32>
    %7 = arith.addf %4, %6 : vector<128x128xf32>
    %cst = arith.constant 0.000000e+00 : f32
    %8 = vector.broadcast %cst : f32 to vector<128x128xf32>
    %9 = arith.maximumf %7, %8 : vector<128x128xf32>
    %10 = arith.truncf %9 : vector<128x128xf32> to vector<128x128xbf16>
    %c0_5 = arith.constant 0 : index
    %c0_6 = arith.constant 0 : index
    %11 = vector.load %arg4[%c0_5, %c0_6] : memref<128x128xbf16, #tpu.memory_space<vmem>>, vector<128x128xbf16>
    tpu.vector_store %arg4[%c0_5, %c0_6], %10 {strides = array<i32>} : memref<128x128xbf16, #tpu.memory_space<vmem>>, vector<128x128xbf16>,
    return
  }
  func.func @transform_0(%arg0: i32) -> (i32, i32) {
    %c0_i32 = arith.constant 0 : i32
    %c0_i32_0 = arith.constant 0 : i32
    return %arg0, %c0_i32 : i32, i32
  }
  func.func @transform_1(%arg0: i32) -> (i32, i32) {
    %c0_i32 = arith.constant 0 : i32
    %c0_i32_0 = arith.constant 0 : i32
    %c0_i32_1 = arith.constant 0 : i32
    return %c0_i32, %c0_i32_0 : i32, i32
  }
  func.func @transform_2(%arg0: i32) -> (i32, i32) {
    %c0_i32 = arith.constant 0 : i32
    %c0_i32_0 = arith.constant 0 : i32
    %c0_i32_1 = arith.constant 0 : i32
    return %c0_i32, %c0_i32_0 : i32, i32
  }
  func.func @transform_3(%arg0: i32) -> (i32, i32) {
    %c0_i32 = arith.constant 0 : i32
    %c0_i32_0 = arith.constant 0 : i32
    return %arg0, %c0_i32 : i32, i32
  }
}

module attributes {stable_mosaic.version = 11 : i64} {
  func.func @_conv_stats_kernel(%arg0: i32, %arg1: memref<128x256xbf16, #tpu.memory_space<vmem>>, %arg2: memref<256x128xbf16, #tpu.memory_space<vmem>>, %arg3: memref<128x128xbf16, #tpu.memory_space<vmem>>, %arg4: memref<8x128xf32, #tpu.memory_space<vmem>>) attributes {dimension_semantics = [#tpu.dimension_semantics<parallel>], iteration_bounds = array<i64: 1>, scalar_prefetch = 0 : i64, scratch_operands = 0 : i64, tpu.core_type = #tpu.core_type<tc>, window_params = [{transform_indices = @transform_0, window_bounds = array<i64: 128, 256>}, {pipeline_mode = #tpu.pipeline_mode<synchronous>, transform_indices = @transform_1, window_bounds = array<i64: 256, 128>}, {transform_indices = @transform_2, window_bounds = array<i64: 128, 128>}, {transform_indices = @transform_3, window_bounds = array<i64: 8, 128>}]} {
    %c0 = arith.constant 0 : index
    %c0_0 = arith.constant 0 : index
    %0 = vector.load %arg1[%c0, %c0_0] : memref<128x256xbf16, #tpu.memory_space<vmem>>, vector<128x256xbf16>
    %c0_1 = arith.constant 0 : index
    %c0_2 = arith.constant 0 : index
    %1 = vector.load %arg2[%c0_1, %c0_2] : memref<256x128xbf16, #tpu.memory_space<vmem>>, vector<256x128xbf16>
    %cst = arith.constant dense<0.000000e+00> : vector<128x128xf32>
    %2 = tpu.matmul %0, %1, %cst {dimension_numbers = #tpu.dot_dimension_numbers<[1], [0], [0], [1], [0, 0, 1, 1], [], []>} : vector<128x256xbf16>, vector<256x128xbf16>, vector<128x128xf32> -> vector<128x128xf32>
    %3 = arith.truncf %2 : vector<128x128xf32> to vector<128x128xbf16>
    %c0_3 = arith.constant 0 : index
    %c0_4 = arith.constant 0 : index
    %4 = vector.load %arg3[%c0_3, %c0_4] : memref<128x128xbf16, #tpu.memory_space<vmem>>, vector<128x128xbf16>
    tpu.vector_store %arg3[%c0_3, %c0_4], %3 {strides = array<i32>} : memref<128x128xbf16, #tpu.memory_space<vmem>>, vector<128x128xbf16>,
    %cst_5 = arith.constant dense<0.000000e+00> : vector<128xf32>
    %5 = vector.multi_reduction <add>, %2, %cst_5 [0] : vector<128x128xf32> to vector<128xf32>
    %6 = vector.shape_cast %5 : vector<128xf32> to vector<1x128xf32>
    %7 = arith.mulf %2, %2 : vector<128x128xf32>
    %cst_6 = arith.constant dense<0.000000e+00> : vector<128xf32>
    %8 = vector.multi_reduction <add>, %7, %cst_6 [0] : vector<128x128xf32> to vector<128xf32>
    %9 = vector.shape_cast %8 : vector<128xf32> to vector<1x128xf32>
    %cst_7 = arith.constant 0.000000e+00 : f32
    %10 = vector.broadcast %cst_7 : f32 to vector<6x128xf32>
    %11 = tpu.concatenate %6, %9, %10 in 0 : vector<1x128xf32>, vector<1x128xf32>, vector<6x128xf32> -> vector<8x128xf32>
    %c0_8 = arith.constant 0 : index
    %c0_9 = arith.constant 0 : index
    %12 = vector.load %arg4[%c0_8, %c0_9] : memref<8x128xf32, #tpu.memory_space<vmem>>, vector<8x128xf32>
    tpu.vector_store %arg4[%c0_8, %c0_9], %11 {strides = array<i32>} : memref<8x128xf32, #tpu.memory_space<vmem>>, vector<8x128xf32>,
    return
  }
  func.func @transform_0(%arg0: i32) -> (i32, i32) {
    %c0_i32 = arith.constant 0 : i32
    %c0_i32_0 = arith.constant 0 : i32
    return %arg0, %c0_i32 : i32, i32
  }
  func.func @transform_1(%arg0: i32) -> (i32, i32) {
    %c0_i32 = arith.constant 0 : i32
    %c0_i32_0 = arith.constant 0 : i32
    %c0_i32_1 = arith.constant 0 : i32
    return %c0_i32, %c0_i32_0 : i32, i32
  }
  func.func @transform_2(%arg0: i32) -> (i32, i32) {
    %c0_i32 = arith.constant 0 : i32
    %c0_i32_0 = arith.constant 0 : i32
    return %arg0, %c0_i32 : i32, i32
  }
  func.func @transform_3(%arg0: i32) -> (i32, i32) {
    %c0_i32 = arith.constant 0 : i32
    %c0_i32_0 = arith.constant 0 : i32
    return %arg0, %c0_i32 : i32, i32
  }
}

module attributes {stable_mosaic.version = 11 : i64} {
  func.func @_bn_apply_residual_kernel(%arg0: i32, %arg1: memref<128x128xbf16, #tpu.memory_space<vmem>>, %arg2: memref<1x128xf32, #tpu.memory_space<vmem>>, %arg3: memref<1x128xf32, #tpu.memory_space<vmem>>, %arg4: memref<128x128xbf16, #tpu.memory_space<vmem>>, %arg5: memref<1x128xf32, #tpu.memory_space<vmem>>, %arg6: memref<1x128xf32, #tpu.memory_space<vmem>>, %arg7: memref<128x128xf32, #tpu.memory_space<vmem>>) attributes {dimension_semantics = [#tpu.dimension_semantics<parallel>], iteration_bounds = array<i64: 1>, scalar_prefetch = 0 : i64, scratch_operands = 0 : i64, tpu.core_type = #tpu.core_type<tc>, window_params = [{transform_indices = @transform_0, window_bounds = array<i64: 128, 128>}, {pipeline_mode = #tpu.pipeline_mode<synchronous>, transform_indices = @transform_1, window_bounds = array<i64: 1, 128>}, {pipeline_mode = #tpu.pipeline_mode<synchronous>, transform_indices = @transform_2, window_bounds = array<i64: 1, 128>}, {transform_indices = @transform_3, window_bounds = array<i64: 128, 128>}, {pipeline_mode = #tpu.pipeline_mode<synchronous>, transform_indices = @transform_4, window_bounds = array<i64: 1, 128>}, {pipeline_mode = #tpu.pipeline_mode<synchronous>, transform_indices = @transform_5, window_bounds = array<i64: 1, 128>}, {transform_indices = @transform_6, window_bounds = array<i64: 128, 128>}]} {
    %c0 = arith.constant 0 : index
    %c0_0 = arith.constant 0 : index
    %0 = vector.load %arg1[%c0, %c0_0] : memref<128x128xbf16, #tpu.memory_space<vmem>>, vector<128x128xbf16>
    %1 = arith.extf %0 : vector<128x128xbf16> to vector<128x128xf32>
    %c0_1 = arith.constant 0 : index
    %c0_2 = arith.constant 0 : index
    %2 = vector.load %arg2[%c0_1, %c0_2] : memref<1x128xf32, #tpu.memory_space<vmem>>, vector<1x128xf32>
    %3 = vector.broadcast %2 : vector<1x128xf32> to vector<128x128xf32>
    %4 = arith.mulf %1, %3 : vector<128x128xf32>
    %c0_3 = arith.constant 0 : index
    %c0_4 = arith.constant 0 : index
    %5 = vector.load %arg3[%c0_3, %c0_4] : memref<1x128xf32, #tpu.memory_space<vmem>>, vector<1x128xf32>
    %6 = vector.broadcast %5 : vector<1x128xf32> to vector<128x128xf32>
    %7 = arith.addf %4, %6 : vector<128x128xf32>
    %c0_5 = arith.constant 0 : index
    %c0_6 = arith.constant 0 : index
    %8 = vector.load %arg4[%c0_5, %c0_6] : memref<128x128xbf16, #tpu.memory_space<vmem>>, vector<128x128xbf16>
    %9 = arith.extf %8 : vector<128x128xbf16> to vector<128x128xf32>
    %c0_7 = arith.constant 0 : index
    %c0_8 = arith.constant 0 : index
    %10 = vector.load %arg5[%c0_7, %c0_8] : memref<1x128xf32, #tpu.memory_space<vmem>>, vector<1x128xf32>
    %11 = vector.broadcast %10 : vector<1x128xf32> to vector<128x128xf32>
    %12 = arith.mulf %9, %11 : vector<128x128xf32>
    %c0_9 = arith.constant 0 : index
    %c0_10 = arith.constant 0 : index
    %13 = vector.load %arg6[%c0_9, %c0_10] : memref<1x128xf32, #tpu.memory_space<vmem>>, vector<1x128xf32>
    %14 = vector.broadcast %13 : vector<1x128xf32> to vector<128x128xf32>
    %15 = arith.addf %12, %14 : vector<128x128xf32>
    %16 = arith.addf %7, %15 : vector<128x128xf32>
    %cst = arith.constant 0.000000e+00 : f32
    %17 = vector.broadcast %cst : f32 to vector<128x128xf32>
    %18 = arith.maximumf %16, %17 : vector<128x128xf32>
    %c0_11 = arith.constant 0 : index
    %c0_12 = arith.constant 0 : index
    %19 = vector.load %arg7[%c0_11, %c0_12] : memref<128x128xf32, #tpu.memory_space<vmem>>, vector<128x128xf32>
    tpu.vector_store %arg7[%c0_11, %c0_12], %18 {strides = array<i32>} : memref<128x128xf32, #tpu.memory_space<vmem>>, vector<128x128xf32>,
    return
  }
  func.func @transform_0(%arg0: i32) -> (i32, i32) {
    %c0_i32 = arith.constant 0 : i32
    %c0_i32_0 = arith.constant 0 : i32
    return %arg0, %c0_i32 : i32, i32
  }
  func.func @transform_1(%arg0: i32) -> (i32, i32) {
    %c0_i32 = arith.constant 0 : i32
    %c0_i32_0 = arith.constant 0 : i32
    %c0_i32_1 = arith.constant 0 : i32
    return %c0_i32, %c0_i32_0 : i32, i32
  }
  func.func @transform_2(%arg0: i32) -> (i32, i32) {
    %c0_i32 = arith.constant 0 : i32
    %c0_i32_0 = arith.constant 0 : i32
    %c0_i32_1 = arith.constant 0 : i32
    return %c0_i32, %c0_i32_0 : i32, i32
  }
  func.func @transform_3(%arg0: i32) -> (i32, i32) {
    %c0_i32 = arith.constant 0 : i32
    %c0_i32_0 = arith.constant 0 : i32
    return %arg0, %c0_i32 : i32, i32
  }
  func.func @transform_4(%arg0: i32) -> (i32, i32) {
    %c0_i32 = arith.constant 0 : i32
    %c0_i32_0 = arith.constant 0 : i32
    %c0_i32_1 = arith.constant 0 : i32
    return %c0_i32, %c0_i32_0 : i32, i32
  }
  func.func @transform_5(%arg0: i32) -> (i32, i32) {
    %c0_i32 = arith.constant 0 : i32
    %c0_i32_0 = arith.constant 0 : i32
    %c0_i32_1 = arith.constant 0 : i32
    return %c0_i32, %c0_i32_0 : i32, i32
  }
  func.func @transform_6(%arg0: i32) -> (i32, i32) {
    %c0_i32 = arith.constant 0 : i32
    %c0_i32_0 = arith.constant 0 : i32
    return %arg0, %c0_i32 : i32, i32
  }
}

</mosaic_0001>

<bundles_post_ra>
// kernel: residual_block_3d.6
= control target key start
LH: loop header
LB: loop body
LE: loop exit
PB: predicated region body
PF: predicated region fallthrough
CT: control target
= control target key end

     0   :  { %s422_s0 = inlined_call_operand.vmem [shape: bf16[128,128], index: 0, kind: input, shape index: {}]   ;;  %s423_s1 = inlined_call_operand.vmem [shape: f32[1,128], index: 1, kind: input, shape index: {}]   ;;  %s424_s2 = inlined_call_operand.vmem [shape: f32[1,128], index: 2, kind: input, shape index: {}]   ;;  %s425_s3 = inlined_call_operand.vmem [shape: bf16[128,128], index: 3, kind: output, shape index: {}]  }
   0x1   :  { %v227_v0 = vld [vmem:[%s422_s0] sm:$0xff]   ;;  %v298_v4 = vld [vmem:[%s422_s0 + $0x8] sm:$0xff]   ;;  %v299_v5 = vld [vmem:[%s422_s0 + $0x10] sm:$0xff]  }
   0x2   :  { %v338_v1 = vld [vmem:[%s423_s1] ss:$0 sm:$0xff]  ;;  %v228_v2 = vunpack.c.l.bf16 %v227_v0  ;;  %v229_v3 = vunpack.c.h.bf16 %v227_v0  ;;  %v300_v6 = vld [vmem:[%s422_s0 + $0x18] sm:$0xff]   ;;  %v232_v8 = vunpack.c.l.bf16 %v298_v4  ;;  %v233_v9 = vunpack.c.h.bf16 %v298_v4  ;;  %v302_v33 = vld [vmem:[%s422_s0 + $0x28] sm:$0xff]  }
   0x3   :  { %v352_v7 = vld [vmem:[%s424_s2] ss:$0 sm:$0xff]  ;;  %v236_v10 = vunpack.c.l.bf16 %v299_v5  ;;  %v237_v11 = vunpack.c.h.bf16 %v299_v5  ;;  %v240_v14 = vunpack.c.l.bf16 %v300_v6  ;;  %v241_v15 = vunpack.c.h.bf16 %v300_v6  ;;  %v303_v38 = vld [vmem:[%s422_s0 + $0x30] sm:$0xff]   ;;  %v304_v43 = vld [vmem:[%s422_s0 + $0x38] sm:$0xff]  }
   0x4   :  { %v53_v12 = vmul.f32 %v228_v2, %v338_v1  ;;  %v54_v13 = vmul.f32 %v229_v3, %v338_v1  ;;  %v55_v16 = vmul.f32 %v232_v8, %v338_v1  ;;  %v56_v17 = vmul.f32 %v233_v9, %v338_v1  ;;  %v301_v28 = vld [vmem:[%s422_s0 + $0x20] sm:$0xff]  }
   0x5   :  { %v57_v18 = vmul.f32 %v236_v10, %v338_v1  ;;  %v58_v19 = vmul.f32 %v237_v11, %v338_v1  ;;  %v59_v22 = vmul.f32 %v240_v14, %v338_v1  ;;  %v60_v23 = vmul.f32 %v241_v15, %v338_v1 }
   0x6   :  { %v76_v20 = vadd.f32 %v352_v7, %v53_v12  ;;  %v77_v21 = vadd.f32 %v352_v7, %v54_v13  ;;  %v78_v24 = vadd.f32 %v352_v7, %v55_v16  ;;  %v79_v25 = vadd.f32 %v352_v7, %v56_v17 }
   0x7   :  { %v80_v26 = vadd.f32 %v352_v7, %v57_v18  ;;  %v81_v27 = vadd.f32 %v352_v7, %v58_v19  ;;  %v82_v31 = vadd.f32 %v352_v7, %v59_v22  ;;  %v83_v32 = vadd.f32 %v352_v7, %v60_v23 }
   0x8   :  { %v92_v29 = vmax.f32 %v76_v20, 0.0  ;;  %v93_v30 = vmax.f32 %v77_v21, 0.0  ;;  %v94_v34 = vmax.f32 %v78_v24, 0.0  ;;  %v95_v35 = vmax.f32 %v79_v25, 0.0 }
   0x9   :  { %v96_v36 = vmax.f32 %v80_v26, 0.0  ;;  %v97_v37 = vmax.f32 %v81_v27, 0.0  ;;  %v98_v40 = vmax.f32 %v82_v31, 0.0  ;;  %v99_v41 = vmax.f32 %v83_v32, 0.0 }
   0xa   :  { %v261_v39 = vpack.c.bf16 %v93_v30, %v92_v29  ;;  %v244_v42 = vunpack.c.l.bf16 %v301_v28  ;;  %v266_v44 = vpack.c.bf16 %v95_v35, %v94_v34  ;;  %v245_v46 = vunpack.c.h.bf16 %v301_v28 }
   0xb   :  { %v271_v45 = vpack.c.bf16 %v97_v37, %v96_v36  ;;  %v248_v47 = vunpack.c.l.bf16 %v302_v33  ;;  %v276_v48 = vpack.c.bf16 %v99_v41, %v98_v40  ;;  %v249_v50 = vunpack.c.h.bf16 %v302_v33 }
   0xc   :  { %262 = vst [vmem:[%s425_s3] sm:$0xff] %v261_v39   ;;  %v61_v49 = vmul.f32 %v244_v42, %v338_v1  ;;  %v252_v51 = vunpack.c.l.bf16 %v303_v38  ;;  %305 = vst [vmem:[%s425_s3 + $0x8] sm:$0xff] %v266_v44   ;;  %v62_v52 = vmul.f32 %v245_v46, %v338_v1  ;;  %v253_v54 = vunpack.c.h.bf16 %v303_v38 }
   0xd   :  { %306 = vst [vmem:[%s425_s3 + $0x10] sm:$0xff] %v271_v45   ;;  %v63_v53 = vmul.f32 %v248_v47, %v338_v1  ;;  %v256_v55 = vunpack.c.l.bf16 %v304_v43  ;;  %307 = vst [vmem:[%s425_s3 + $0x18] sm:$0xff] %v276_v48   ;;  %v64_v57 = vmul.f32 %v249_v50, %v338_v1  ;;  %v257_v59 = vunpack.c.h.bf16 %v304_v43 }
   0xe   :  { %v84_v56 = vadd.f32 %v352_v7, %v61_v49  ;;  %v65_v58 = vmul.f32 %v252_v51, %v338_v1  ;;  %v85_v60 = vadd.f32 %v352_v7, %v62_v52  ;;  %v66_v62 = vmul.f32 %v253_v54, %v338_v1 }
   0xf   :  { %v86_v61 = vadd.f32 %v352_v7, %v63_v53  ;;  %v67_v63 = vmul.f32 %v256_v55, %v338_v1  ;;  %v87_v2 = vadd.f32 %v352_v7, %v64_v57  ;;  %v68_v4 = vmul.f32 %v257_v59, %v338_v1 }
  0x10   :  { %v100_v0 = vmax.f32 %v84_v56, 0.0  ;;  %v88_v3 = vadd.f32 %v352_v7, %v65_v58  ;;  %v101_v5 = vmax.f32 %v85_v60, 0.0  ;;  %v89_v8 = vadd.f32 %v352_v7, %v66_v62 }
  0x11   :  { %v102_v6 = vmax.f32 %v86_v61, 0.0  ;;  %v90_v9 = vadd.f32 %v352_v7, %v67_v63  ;;  %v103_v10 = vmax.f32 %v87_v2, 0.0  ;;  %v91_v12 = vadd.f32 %v352_v7, %v68_v4 }
  0x12   :  { %v104_v11 = vmax.f32 %v88_v3, 0.0  ;;  %v281_v13 = vpack.c.bf16 %v101_v5, %v100_v0  ;;  %v105_v14 = vmax.f32 %v89_v8, 0.0 }
  0x13   :  { %v106_v15 = vmax.f32 %v90_v9, 0.0  ;;  %v286_v16 = vpack.c.bf16 %v103_v10, %v102_v6  ;;  %v107_v17 = vmax.f32 %v91_v12, 0.0 }
  0x14   :  { %308 = vst [vmem:[%s425_s3 + $0x20] sm:$0xff] %v281_v13   ;;  %v291_v1 = vpack.c.bf16 %v105_v14, %v104_v11 }
  0x15   :  { %309 = vst [vmem:[%s425_s3 + $0x28] sm:$0xff] %v286_v16   ;;  %v296_v18 = vpack.c.bf16 %v107_v17, %v106_v15 }
  0x16   :  { %310 = vst [vmem:[%s425_s3 + $0x30] sm:$0xff] %v291_v1  }
  0x17   :  { %311 = vst [vmem:[%s425_s3 + $0x38] sm:$0xff] %v296_v18  }

// kernel: residual_block_3d.5
= control target key start
LH: loop header
LB: loop body
LE: loop exit
PB: predicated region body
PF: predicated region fallthrough
CT: control target
= control target key end

     0   :  { %vm377_vm0 = vcmask 1040384   ;;  %vm379_vm1 = vcmask 1041408   ;;  %s660_s1 = inlined_call_operand.vmem [shape: bf16[128,128], index: 1, kind: input, shape index: {}]   ;;  %s661_s0 = inlined_call_operand.vmem [shape: bf16[128,128], index: 0, kind: input, shape index: {}]   ;;  %s662_s2 = inlined_call_operand.vmem [shape: bf16[128,128], index: 2, kind: output, shape index: {0}]   ;;  %s663_s3 = inlined_call_operand.vmem [shape: f32[8,128], index: 3, kind: output, shape index: {1}]  }
   0x1   :  { %v549_v0 = vld [vmem:[%s660_s1] sm:$0xff]   ;;  %v550_v1 = vld [vmem:[%s660_s1 + $0x8] sm:$0xff]   ;;  %v551_v2 = vld [vmem:[%s660_s1 + $0x10] sm:$0xff]  }
   0x2   :  { %501 = vmatprep.subr.bf16.mxu0 %v549_v0  ;;  %533 = vmatprep.subr.bf16.mxu1 %v549_v0  ;;  %v552_v3 = vld [vmem:[%s660_s1 + $0x18] sm:$0xff]   ;;  %v557_v4 = vld [vmem:[%s661_s0] sm:$0xff]   ;;  %v554_v7 = vld [vmem:[%s660_s1 + $0x28] sm:$0xff]  }
   0x3   :  { %502 = vmatpush3.bf16.msra.mxu0 %v549_v0  ;;  %541 = vmatpush3.bf16.msra.mxu1 %v549_v0  ;;  %v553_v5 = vld [vmem:[%s660_s1 + $0x20] sm:$0xff]   ;;  %v555_v8 = vld [vmem:[%s660_s1 + $0x30] sm:$0xff]   ;;  %v556_v9 = vld [vmem:[%s660_s1 + $0x38] sm:$0xff]  }
   0x4   :  { %503 = vmatprep.subr.bf16.mxu0 %v550_v1  ;;  %534 = vmatprep.subr.bf16.mxu1 %v550_v1  ;;  %v561_v6 = vld [vmem:[%s661_s0 + $0x20] sm:$0xff]   ;;  %v558_v10 = vld [vmem:[%s661_s0 + $0x8] sm:$0xff]   ;;  %v559_v12 = vld [vmem:[%s661_s0 + $0x10] sm:$0xff]  }
   0x5   :  { %517 = vmatprep.mubr.bf16.mxu0 %v557_v4  ;;  %525 = vmatprep.mubr.bf16.mxu1 %v561_v6  ;;  %v562_v11 = vld [vmem:[%s661_s0 + $0x28] sm:$0xff]   ;;  %v563_v13 = vld [vmem:[%s661_s0 + $0x30] sm:$0xff]   ;;  %v560_v14 = vld [vmem:[%s661_s0 + $0x18] sm:$0xff]  }
   0x6   :  { %v564_v15 = vld [vmem:[%s661_s0 + $0x38] sm:$0xff]  }
   0x7   :  { %504 = vmatpush3.bf16.msra.mxu0 %v550_v1  ;;  %542 = vmatpush3.bf16.msra.mxu1 %v550_v1 }
   0x8   :  { %505 = vmatprep.subr.bf16.mxu0 %v551_v2  ;;  %535 = vmatprep.subr.bf16.mxu1 %v551_v2 }
   0xb   :  { %506 = vmatpush3.bf16.msra.mxu0 %v551_v2  ;;  %543 = vmatpush3.bf16.msra.mxu1 %v551_v2 }
   0xc   :  { %507 = vmatprep.subr.bf16.mxu0 %v552_v3  ;;  %536 = vmatprep.subr.bf16.mxu1 %v552_v3 }
   0xf   :  { %508 = vmatpush3.bf16.msra.mxu0 %v552_v3  ;;  %544 = vmatpush3.bf16.msra.mxu1 %v552_v3 }
  0x10   :  { %509 = vmatprep.subr.bf16.mxu0 %v553_v5  ;;  %537 = vmatprep.subr.bf16.mxu1 %v553_v5 }
  0x13   :  { %510 = vmatpush3.bf16.msra.mxu0 %v553_v5  ;;  %545 = vmatpush3.bf16.msra.mxu1 %v553_v5 }
  0x14   :  { %511 = vmatprep.subr.bf16.mxu0 %v554_v7  ;;  %538 = vmatprep.subr.bf16.mxu1 %v554_v7 }
  0x17   :  { %512 = vmatpush3.bf16.msra.mxu0 %v554_v7  ;;  %546 = vmatpush3.bf16.msra.mxu1 %v554_v7 }
  0x18   :  { %513 = vmatprep.subr.bf16.mxu0 %v555_v8  ;;  %539 = vmatprep.subr.bf16.mxu1 %v555_v8 }
  0x1b   :  { %514 = vmatpush3.bf16.msra.mxu0 %v555_v8  ;;  %547 = vmatpush3.bf16.msra.mxu1 %v555_v8 }
  0x1c   :  { %515 = vmatprep.subr.bf16.mxu0 %v556_v9  ;;  %540 = vmatprep.subr.bf16.mxu1 %v556_v9 }
  0x1f   :  { %516 = vmatpush3.bf16.msra.mxu0 %v556_v9  ;;  %548 = vmatpush3.bf16.msra.mxu1 %v556_v9 }
  0x22   :  { %518 = vmatmul.mubr.bf16.vlgmr.msra.gmra.mrb[0].mxu0 %v558_v10  ;;  %526 = vmatmul.mubr.bf16.vlgmr.msra.gmra.mrb[0].mxu1 %v562_v11 }
  0x23   :  { %521 = vmatprep.mubr.bf16.mxu0 %v559_v12  ;;  %529 = vmatprep.mubr.bf16.mxu1 %v563_v13 }
  0x2a   :  { %522 = vmatmul.mubr.bf16.gmra.mrb[4].mxu0 %v560_v14  ;;  %530 = vmatmul.mubr.bf16.gmra.mrb[4].mxu1 %v564_v15 }
  0xf5   :  { %v519_v16 = vpop.f32.mrb[0].mxu0  ;;  %v527_v17 = vpop.f32.mrb[0].mxu1 }
  0xf6   :  { %v176_v18 = vpop.f32.mrb[1].mxu0  ;;  %v208_v19 = vpop.f32.mrb[1].mxu1  ;;  %v342_v31 = vmul.f32 %v519_v16, %v519_v16  ;;  %v350_v3 = vmul.f32 %v527_v17, %v527_v17 }
  0xf7   :  { %v520_v20 = vpop.f32.mrb[2].mxu0  ;;  %v528_v21 = vpop.f32.mrb[2].mxu1  ;;  %v340_v22 = vmul.f32 %v176_v18, %v176_v18  ;;  %v348_v61 = vmul.f32 %v208_v19, %v208_v19 }
  0xf8   :  { %v446_v23 = vpack.c.bf16 %v520_v20, %v519_v16  ;;  %v179_v24 = vpop.f32.mrb[3].mxu0  ;;  %v466_v25 = vpack.c.bf16 %v528_v21, %v527_v17  ;;  %v211_v26 = vpop.f32.mrb[3].mxu1  ;;  %v343_v34 = vmul.f32 %v520_v20, %v520_v20  ;;  %v351_v6 = vmul.f32 %v528_v21, %v528_v21 }
  0xf9   :  { %v441_v27 = vpack.c.bf16 %v179_v24, %v176_v18  ;;  %v319_v28 = vadd.f32 %v179_v24, %v176_v18  ;;  %v341_v29 = vmul.f32 %v179_v24, %v179_v24  ;;  %v461_v30 = vpack.c.bf16 %v211_v26, %v208_v19 }
  0xfa   :  { %478 = vst [vmem:[%s662_s2 + $0x8] sm:$0xff] %v446_v23   ;;  %482 = vst [vmem:[%s662_s2 + $0x28] sm:$0xff] %v466_v25   ;;  %v349_v2 = vmul.f32 %v211_v26, %v211_v26 }
  0xfb   :  { %442 = vst [vmem:[%s662_s2] sm:$0xff] %v441_v27   ;;  %v320_v32 = vadd.f32 %v519_v16, %v319_v28  ;;  %v356_v33 = vadd.f32 %v341_v29, %v340_v22  ;;  %481 = vst [vmem:[%s662_s2 + $0x20] sm:$0xff] %v461_v30  }
  0xfd   :  { %v357_v35 = vadd.f32 %v356_v33, %v342_v31  ;;  %v523_v36 = vpop.f32.mrb[4].mxu0  ;;  %v321_v37 = vadd.f32 %v520_v20, %v320_v32  ;;  %v531_v38 = vpop.f32.mrb[4].mxu1 }
  0xfe   :  { %v192_v39 = vpop.f32.mrb[5].mxu0  ;;  %v224_v40 = vpop.f32.mrb[5].mxu1  ;;  %v346_v55 = vmul.f32 %v523_v36, %v523_v36  ;;  %v354_v15 = vmul.f32 %v531_v38, %v531_v38 }
  0xff   :  { %v322_v41 = vadd.f32 %v321_v37, %v192_v39  ;;  %v344_v42 = vmul.f32 %v192_v39, %v192_v39  ;;  %v358_v43 = vadd.f32 %v357_v35, %v343_v34  ;;  %v524_v44 = vpop.f32.mrb[6].mxu0  ;;  %v532_v45 = vpop.f32.mrb[6].mxu1  ;;  %v352_v9 = vmul.f32 %v224_v40, %v224_v40 }
 0x100   :  { %v456_v46 = vpack.c.bf16 %v524_v44, %v523_v36  ;;  %v195_v47 = vpop.f32.mrb[7].mxu0  ;;  %v476_v48 = vpack.c.bf16 %v532_v45, %v531_v38  ;;  %v227_v49 = vpop.f32.mrb[7].mxu1  ;;  %v347_v58 = vmul.f32 %v524_v44, %v524_v44 }
 0x101   :  { %v359_v50 = vadd.f32 %v358_v43, %v344_v42  ;;  %v451_v51 = vpack.c.bf16 %v195_v47, %v192_v39  ;;  %v323_v52 = vadd.f32 %v322_v41, %v195_v47  ;;  %v345_v53 = vmul.f32 %v195_v47, %v195_v47 }
 0x102   :  { %480 = vst [vmem:[%s662_s2 + $0x18] sm:$0xff] %v456_v46   ;;  %484 = vst [vmem:[%s662_s2 + $0x38] sm:$0xff] %v476_v48   ;;  %v471_v54 = vpack.c.bf16 %v227_v49, %v224_v40  ;;  %v353_v14 = vmul.f32 %v227_v49, %v227_v49 }
 0x103   :  { %479 = vst [vmem:[%s662_s2 + $0x10] sm:$0xff] %v451_v51   ;;  %v324_v56 = vadd.f32 %v523_v36, %v323_v52  ;;  %v360_v57 = vadd.f32 %v359_v50, %v345_v53 }
 0x104   :  { %483 = vst [vmem:[%s662_s2 + $0x30] sm:$0xff] %v471_v54  }
 0x105   :  { %v361_v59 = vadd.f32 %v360_v57, %v346_v55  ;;  %v325_v60 = vadd.f32 %v524_v44, %v324_v56 }
 0x107   :  { %v326_v62 = vadd.f32 %v325_v60, %v208_v19  ;;  %v362_v63 = vadd.f32 %v361_v59, %v347_v58  ;;  %v355_v19 = vmul.f32 %v532_v45, %v532_v45 }
 0x109   :  { %v363_v0 = vadd.f32 %v362_v63, %v348_v61  ;;  %v327_v1 = vadd.f32 %v326_v62, %v211_v26 }
 0x10b   :  { %v328_v4 = vadd.f32 %v527_v17, %v327_v1  ;;  %v364_v5 = vadd.f32 %v363_v0, %v349_v2 }
 0x10d   :  { %v365_v7 = vadd.f32 %v364_v5, %v350_v3  ;;  %v329_v8 = vadd.f32 %v528_v21, %v328_v4 }
 0x10f   :  { %v330_v10 = vadd.f32 %v329_v8, %v224_v40  ;;  %v366_v11 = vadd.f32 %v365_v7, %v351_v6 }
 0x111   :  { %v367_v12 = vadd.f32 %v366_v11, %v352_v9  ;;  %v331_v13 = vadd.f32 %v330_v10, %v227_v49 }
 0x113   :  { %v332_v16 = vadd.f32 %v531_v38, %v331_v13  ;;  %v368_v18 = vadd.f32 %v367_v12, %v353_v14 }
 0x115   :  { %v333_v20 = vadd.f32 %v532_v45, %v332_v16  ;;  %v369_v22 = vadd.f32 %v368_v18, %v354_v15 }
 0x117   :  { %v334_v23 = vrot.slane %v333_v20, 4  ;;  %v370_v24 = vadd.f32 %v369_v22, %v355_v19 }
 0x119   :  { %v335_v25 = vadd.f32 %v334_v23, %v333_v20  ;;  %v371_v17 = vrot.slane %v370_v24, 4 }
 0x11b   :  { %v336_v26 = vrot.slane %v335_v25, 2  ;;  %v372_v27 = vadd.f32 %v371_v17, %v370_v24 }
 0x11d   :  { %v337_v28 = vadd.f32 %v336_v26, %v335_v25  ;;  %v373_v21 = vrot.slane %v372_v27, 2 }
 0x11f   :  { %v338_v29 = vrot.slane %v337_v28, 1  ;;  %v374_v30 = vadd.f32 %v373_v21, %v372_v27 }
 0x121   :  { %v375_v31 = vrot.slane %v374_v30, 1  ;;  %v339_v32 = vadd.f32 %v338_v29, %v337_v28 }
 0x123   :  { %v376_v33 = vadd.f32 %v375_v31, %v374_v30 }
 0x125   :  { %v378_v34 = vsel %vm377_vm0, %v339_v32, %v376_v33 }
 0x126   :  { %v380_v35 = vsel %vm379_vm1, %v378_v34, 0.0 }
 0x127   :  { %381 = vst [vmem:[%s663_s3] sm:$0xff] %v380_v35 }

// kernel: residual_block_3d.8
= control target key start
LH: loop header
LB: loop body
LE: loop exit
PB: predicated region body
PF: predicated region fallthrough
CT: control target
= control target key end

     0   :  { %vm473_vm0 = vcmask 1040384   ;;  %vm475_vm1 = vcmask 1041408   ;;  %s878_s1 = inlined_call_operand.vmem [shape: bf16[256,128], index: 1, kind: input, shape index: {}]   ;;  %s879_s0 = inlined_call_operand.vmem [shape: bf16[128,256], index: 0, kind: input, shape index: {}]   ;;  %s880_s2 = inlined_call_operand.vmem [shape: bf16[128,128], index: 2, kind: output, shape index: {0}]   ;;  %s881_s3 = inlined_call_operand.vmem [shape: f32[8,128], index: 3, kind: output, shape index: {1}]  }
   0x1   :  { %v677_v0 = vld [vmem:[%s878_s1 + $0x40] sm:$0xff]   ;;  %v679_v2 = vld [vmem:[%s878_s1 + $0x48] sm:$0xff]   ;;  %v681_v4 = vld [vmem:[%s878_s1 + $0x50] sm:$0xff]  }
   0x2   :  { %v678_v1 = vld [vmem:[%s878_s1] sm:$0xff]   ;;  %597 = vmatprep.subr.bf16.mxu0 %v677_v0  ;;  %661 = vmatprep.subr.bf16.mxu1 %v677_v0  ;;  %v680_v3 = vld [vmem:[%s878_s1 + $0x8] sm:$0xff]   ;;  %v682_v5 = vld [vmem:[%s878_s1 + $0x10] sm:$0xff]  }
   0x3   :  { %598 = vmatpush3.bf16.msra.mxu0 %v678_v1  ;;  %669 = vmatpush3.bf16.msra.mxu1 %v678_v1  ;;  %v683_v6 = vld [vmem:[%s878_s1 + $0x58] sm:$0xff]   ;;  %v685_v8 = vld [vmem:[%s878_s1 + $0x60] sm:$0xff]   ;;  %v687_v10 = vld [vmem:[%s878_s1 + $0x68] sm:$0xff]  }
   0x4   :  { %599 = vmatprep.subr.bf16.mxu0 %v679_v2  ;;  %662 = vmatprep.subr.bf16.mxu1 %v679_v2  ;;  %v684_v7 = vld [vmem:[%s878_s1 + $0x18] sm:$0xff]   ;;  %v686_v9 = vld [vmem:[%s878_s1 + $0x20] sm:$0xff]   ;;  %v688_v12 = vld [vmem:[%s878_s1 + $0x28] sm:$0xff]  }
   0x5   :  { %v695_v11 = vld [vmem:[%s879_s0 + $0x4] ss:$8 sps:$4 sm:$0xff]   ;;  %v689_v14 = vld [vmem:[%s878_s1 + $0x70] sm:$0xff]   ;;  %v691_v16 = vld [vmem:[%s878_s1 + $0x78] sm:$0xff]  }
   0x6   :  { %v701_v13 = vld [vmem:[%s879_s0 + $0x44] ss:$8 sps:$4 sm:$0xff]   ;;  %270 = vmatprep.mubr.bf16.mxu0 %v695_v11  ;;  %v690_v15 = vld [vmem:[%s878_s1 + $0x30] sm:$0xff]   ;;  %v692_v17 = vld [vmem:[%s878_s1 + $0x38] sm:$0xff]  }
   0x7   :  { %600 = vmatpush3.bf16.msra.mxu0 %v680_v3  ;;  %670 = vmatpush3.bf16.msra.mxu1 %v680_v3  ;;  %v693_v18 = vld [vmem:[%s879_s0] ss:$8 sps:$4 sm:$0xff]   ;;  %v696_v20 = vld [vmem:[%s879_s0 + $0x14] ss:$8 sps:$4 sm:$0xff]   ;;  %v698_v22 = vld [vmem:[%s879_s0 + $0x10] ss:$8 sps:$4 sm:$0xff]  }
   0x8   :  { %601 = vmatprep.subr.bf16.mxu0 %v681_v4  ;;  %663 = vmatprep.subr.bf16.mxu1 %v681_v4  ;;  %v699_v19 = vld [vmem:[%s879_s0 + $0x40] ss:$8 sps:$4 sm:$0xff]   ;;  %v705_v21 = vld [vmem:[%s879_s0 + $0x54] ss:$8 sps:$4 sm:$0xff]   ;;  %v707_v23 = vld [vmem:[%s879_s0 + $0x50] ss:$8 sps:$4 sm:$0xff]  }
   0x9   :  { %302 = vmatprep.mubr.bf16.mxu1 %v701_v13  ;;  %v702_v24 = vld [vmem:[%s879_s0 + $0x24] ss:$8 sps:$4 sm:$0xff]   ;;  %v704_v26 = vld [vmem:[%s879_s0 + $0x20] ss:$8 sps:$4 sm:$0xff]   ;;  %v708_v28 = vld [vmem:[%s879_s0 + $0x34] ss:$8 sps:$4 sm:$0xff]  }
   0xa   :  { %v711_v25 = vld [vmem:[%s879_s0 + $0x64] ss:$8 sps:$4 sm:$0xff]   ;;  %v713_v27 = vld [vmem:[%s879_s0 + $0x60] ss:$8 sps:$4 sm:$0xff]   ;;  %v714_v29 = vld [vmem:[%s879_s0 + $0x74] ss:$8 sps:$4 sm:$0xff]  }
   0xb   :  { %602 = vmatpush3.bf16.msra.mxu0 %v682_v5  ;;  %671 = vmatpush3.bf16.msra.mxu1 %v682_v5  ;;  %v710_v30 = vld [vmem:[%s879_s0 + $0x30] ss:$8 sps:$4 sm:$0xff]  }
   0xc   :  { %603 = vmatprep.subr.bf16.mxu0 %v683_v6  ;;  %664 = vmatprep.subr.bf16.mxu1 %v683_v6  ;;  %v716_v31 = vld [vmem:[%s879_s0 + $0x70] ss:$8 sps:$4 sm:$0xff]  }
   0xf   :  { %604 = vmatpush3.bf16.msra.mxu0 %v684_v7  ;;  %672 = vmatpush3.bf16.msra.mxu1 %v684_v7 }
  0x10   :  { %605 = vmatprep.subr.bf16.mxu0 %v685_v8  ;;  %665 = vmatprep.subr.bf16.mxu1 %v685_v8 }
  0x13   :  { %606 = vmatpush3.bf16.msra.mxu0 %v686_v9  ;;  %673 = vmatpush3.bf16.msra.mxu1 %v686_v9 }
  0x14   :  { %607 = vmatprep.subr.bf16.mxu0 %v687_v10  ;;  %666 = vmatprep.subr.bf16.mxu1 %v687_v10 }
  0x17   :  { %608 = vmatpush3.bf16.msra.mxu0 %v688_v12  ;;  %674 = vmatpush3.bf16.msra.mxu1 %v688_v12 }
  0x18   :  { %609 = vmatprep.subr.bf16.mxu0 %v689_v14  ;;  %667 = vmatprep.subr.bf16.mxu1 %v689_v14 }
  0x1b   :  { %610 = vmatpush3.bf16.msra.mxu0 %v690_v15  ;;  %675 = vmatpush3.bf16.msra.mxu1 %v690_v15 }
  0x1c   :  { %611 = vmatprep.subr.bf16.mxu0 %v691_v16  ;;  %668 = vmatprep.subr.bf16.mxu1 %v691_v16 }
  0x1f   :  { %612 = vmatpush3.bf16.msra.mxu0 %v692_v17  ;;  %676 = vmatpush3.bf16.msra.mxu1 %v692_v17 }
  0x22   :  { %271 = vmatmul.mubr.bf16.vlgmr.msra.gmra.mrb[0].mxu0 %v693_v18  ;;  %303 = vmatmul.mubr.bf16.vlgmr.msra.gmra.mrb[0].mxu1 %v699_v19 }
  0x23   :  { %278 = vmatprep.mubr.bf16.mxu0 %v696_v20  ;;  %310 = vmatprep.mubr.bf16.mxu1 %v705_v21 }
  0x2a   :  { %279 = vmatmul.mubr.bf16.gmra.mrb[4].mxu0 %v698_v22  ;;  %311 = vmatmul.mubr.bf16.gmra.mrb[4].mxu1 %v707_v23 }
  0x2b   :  { %286 = vmatprep.mubr.bf16.mxu0 %v702_v24  ;;  %318 = vmatprep.mubr.bf16.mxu1 %v711_v25 }
  0x32   :  { %287 = vmatmul.mubr.bf16.gmra.mrb[8].mxu0 %v704_v26  ;;  %319 = vmatmul.mubr.bf16.gmra.mrb[8].mxu1 %v713_v27 }
  0x33   :  { %294 = vmatprep.mubr.bf16.mxu0 %v708_v28  ;;  %326 = vmatprep.mubr.bf16.mxu1 %v714_v29 }
  0x3a   :  { %295 = vmatmul.mubr.bf16.gmra.mrb[12].mxu0 %v710_v30  ;;  %327 = vmatmul.mubr.bf16.gmra.mrb[12].mxu1 %v716_v31 }
  0xf5   :  { %v613_v32 = vpop.f32.mrb[0].mxu0  ;;  %v637_v33 = vpop.f32.mrb[0].mxu1 }
  0xf6   :  { %v614_v34 = vpop.f32.mrb[1].mxu0  ;;  %v638_v35 = vpop.f32.mrb[1].mxu1 }
  0xf7   :  { %v615_v36 = vadd.f32 %v614_v34, %v613_v32  ;;  %v616_v37 = vpop.f32.mrb[2].mxu0  ;;  %v833_v38 = vadd.f32 %v638_v35, %v637_v33  ;;  %v640_v39 = vpop.f32.mrb[2].mxu1 }
  0xf8   :  { %v617_v40 = vpop.f32.mrb[3].mxu0  ;;  %v641_v41 = vpop.f32.mrb[3].mxu1 }
  0xf9   :  { %v618_v42 = vadd.f32 %v617_v40, %v616_v37  ;;  %v835_v43 = vadd.f32 %v641_v41, %v640_v39  ;;  %v436_v44 = vmul.f32 %v615_v36, %v615_v36 }
  0xfb   :  { %v553_v45 = vpack.c.bf16 %v618_v42, %v615_v36  ;;  %v415_v46 = vadd.f32 %v618_v42, %v615_v36  ;;  %v437_v47 = vmul.f32 %v618_v42, %v618_v42  ;;  %v573_v48 = vpack.c.bf16 %v835_v43, %v833_v38 }
  0xfd   :  { %554 = vst [vmem:[%s880_s2] sm:$0xff] %v553_v45   ;;  %v452_v49 = vadd.f32 %v437_v47, %v436_v44  ;;  %v619_v50 = vpop.f32.mrb[4].mxu0  ;;  %593 = vst [vmem:[%s880_s2 + $0x20] sm:$0xff] %v573_v48   ;;  %v643_v51 = vpop.f32.mrb[4].mxu1  ;;  %v444_v47 = vmul.f32 %v833_v38, %v833_v38 }
  0xfe   :  { %v620_v52 = vpop.f32.mrb[5].mxu0  ;;  %v644_v53 = vpop.f32.mrb[5].mxu1 }
  0xff   :  { %v621_v54 = vadd.f32 %v620_v52, %v619_v50  ;;  %v622_v55 = vpop.f32.mrb[6].mxu0  ;;  %v845_v56 = vadd.f32 %v644_v53, %v643_v51  ;;  %v646_v57 = vpop.f32.mrb[6].mxu1  ;;  %v445_v50 = vmul.f32 %v835_v43, %v835_v43 }
 0x100   :  { %v623_v58 = vpop.f32.mrb[7].mxu0  ;;  %v647_v59 = vpop.f32.mrb[7].mxu1 }
 0x101   :  { %v416_v60 = vadd.f32 %v621_v54, %v415_v46  ;;  %v438_v61 = vmul.f32 %v621_v54, %v621_v54  ;;  %v624_v62 = vadd.f32 %v623_v58, %v622_v55  ;;  %v648_v63 = vadd.f32 %v647_v59, %v646_v57 }
 0x102   :  { %v446_v53 = vmul.f32 %v845_v56, %v845_v56 }
 0x103   :  { %v453_v0 = vadd.f32 %v452_v49, %v438_v61  ;;  %v558_v1 = vpack.c.bf16 %v624_v62, %v621_v54  ;;  %v417_v2 = vadd.f32 %v624_v62, %v416_v60  ;;  %v439_v3 = vmul.f32 %v624_v62, %v624_v62 }
 0x104   :  { %v578_v4 = vpack.c.bf16 %v648_v63, %v845_v56  ;;  %v447_v57 = vmul.f32 %v648_v63, %v648_v63 }
 0x105   :  { %590 = vst [vmem:[%s880_s2 + $0x8] sm:$0xff] %v558_v1   ;;  %v454_v5 = vadd.f32 %v453_v0, %v439_v3  ;;  %v625_v6 = vpop.f32.mrb[8].mxu0  ;;  %v649_v7 = vpop.f32.mrb[8].mxu1 }
 0x106   :  { %v626_v8 = vpop.f32.mrb[9].mxu0  ;;  %594 = vst [vmem:[%s880_s2 + $0x28] sm:$0xff] %v578_v4   ;;  %v650_v9 = vpop.f32.mrb[9].mxu1 }
 0x107   :  { %v627_v10 = vadd.f32 %v626_v8, %v625_v6  ;;  %v628_v11 = vpop.f32.mrb[10].mxu0  ;;  %v651_v12 = vadd.f32 %v650_v9, %v649_v7  ;;  %v652_v13 = vpop.f32.mrb[10].mxu1 }
 0x108   :  { %v629_v14 = vpop.f32.mrb[11].mxu0  ;;  %v653_v15 = vpop.f32.mrb[11].mxu1 }
 0x109   :  { %v418_v16 = vadd.f32 %v627_v10, %v417_v2  ;;  %v440_v17 = vmul.f32 %v627_v10, %v627_v10  ;;  %v630_v18 = vadd.f32 %v629_v14, %v628_v11  ;;  %v654_v19 = vadd.f32 %v653_v15, %v652_v13 }
 0x10a   :  { %v448_v60 = vmul.f32 %v651_v12, %v651_v12 }
 0x10b   :  { %v455_v20 = vadd.f32 %v454_v5, %v440_v17  ;;  %v563_v21 = vpack.c.bf16 %v630_v18, %v627_v10  ;;  %v419_v22 = vadd.f32 %v630_v18, %v418_v16  ;;  %v441_v23 = vmul.f32 %v630_v18, %v630_v18 }
 0x10c   :  { %v583_v24 = vpack.c.bf16 %v654_v19, %v651_v12  ;;  %v449_v1 = vmul.f32 %v654_v19, %v654_v19 }
 0x10d   :  { %591 = vst [vmem:[%s880_s2 + $0x10] sm:$0xff] %v563_v21   ;;  %v456_v25 = vadd.f32 %v455_v20, %v441_v23  ;;  %v631_v26 = vpop.f32.mrb[12].mxu0  ;;  %v655_v27 = vpop.f32.mrb[12].mxu1 }
 0x10e   :  { %v632_v28 = vpop.f32.mrb[13].mxu0  ;;  %595 = vst [vmem:[%s880_s2 + $0x30] sm:$0xff] %v583_v24   ;;  %v656_v29 = vpop.f32.mrb[13].mxu1 }
 0x10f   :  { %v633_v30 = vadd.f32 %v632_v28, %v631_v26  ;;  %v634_v31 = vpop.f32.mrb[14].mxu0  ;;  %v657_v32 = vadd.f32 %v656_v29, %v655_v27  ;;  %v658_v33 = vpop.f32.mrb[14].mxu1 }
 0x110   :  { %v635_v34 = vpop.f32.mrb[15].mxu0  ;;  %v659_v35 = vpop.f32.mrb[15].mxu1 }
 0x111   :  { %v420_v36 = vadd.f32 %v633_v30, %v419_v22  ;;  %v442_v37 = vmul.f32 %v633_v30, %v633_v30  ;;  %v636_v39 = vadd.f32 %v635_v34, %v634_v31  ;;  %v660_v40 = vadd.f32 %v659_v35, %v658_v33 }
 0x112   :  { %v450_v2 = vmul.f32 %v657_v32, %v657_v32 }
 0x113   :  { %v457_v41 = vadd.f32 %v456_v25, %v442_v37  ;;  %v568_v42 = vpack.c.bf16 %v636_v39, %v633_v30  ;;  %v421_v44 = vadd.f32 %v636_v39, %v420_v36  ;;  %v443_v45 = vmul.f32 %v636_v39, %v636_v39 }
 0x114   :  { %v588_v46 = vpack.c.bf16 %v660_v40, %v657_v32  ;;  %v451_v6 = vmul.f32 %v660_v40, %v660_v40 }
 0x115   :  { %592 = vst [vmem:[%s880_s2 + $0x18] sm:$0xff] %v568_v42   ;;  %v422_v48 = vadd.f32 %v833_v38, %v421_v44  ;;  %v458_v49 = vadd.f32 %v457_v41, %v443_v45 }
 0x116   :  { %596 = vst [vmem:[%s880_s2 + $0x38] sm:$0xff] %v588_v46  }
 0x117   :  { %v423_v51 = vadd.f32 %v835_v43, %v422_v48  ;;  %v459_v52 = vadd.f32 %v458_v49, %v444_v47 }
 0x119   :  { %v460_v54 = vadd.f32 %v459_v52, %v445_v50  ;;  %v424_v55 = vadd.f32 %v845_v56, %v423_v51 }
 0x11b   :  { %v425_v58 = vadd.f32 %v648_v63, %v424_v55  ;;  %v461_v38 = vadd.f32 %v460_v54, %v446_v53 }
 0x11d   :  { %v426_v59 = vadd.f32 %v651_v12, %v425_v58  ;;  %v462_v61 = vadd.f32 %v461_v38, %v447_v57 }
 0x11f   :  { %v463_v62 = vadd.f32 %v462_v61, %v448_v60  ;;  %v427_v0 = vadd.f32 %v654_v19, %v426_v59 }
 0x121   :  { %v464_v3 = vadd.f32 %v463_v62, %v449_v1  ;;  %v428_v4 = vadd.f32 %v657_v32, %v427_v0 }
 0x123   :  { %v465_v43 = vadd.f32 %v464_v3, %v450_v2  ;;  %v429_v5 = vadd.f32 %v660_v40, %v428_v4 }
 0x125   :  { %v430_v7 = vrot.slane %v429_v5, 4  ;;  %v466_v8 = vadd.f32 %v465_v43, %v451_v6 }
 0x127   :  { %v431_v9 = vadd.f32 %v430_v7, %v429_v5  ;;  %v467_v10 = vrot.slane %v466_v8, 4 }
 0x129   :  { %v432_v56 = vrot.slane %v431_v9, 2  ;;  %v468_v11 = vadd.f32 %v467_v10, %v466_v8 }
 0x12b   :  { %v433_v63 = vadd.f32 %v432_v56, %v431_v9  ;;  %v469_v13 = vrot.slane %v468_v11, 2 }
 0x12d   :  { %v434_v14 = vrot.slane %v433_v63, 1  ;;  %v470_v12 = vadd.f32 %v469_v13, %v468_v11 }
 0x12f   :  { %v471_v15 = vrot.slane %v470_v12, 1  ;;  %v435_v16 = vadd.f32 %v434_v14, %v433_v63 }
 0x131   :  { %v472_v17 = vadd.f32 %v471_v15, %v470_v12 }
 0x133   :  { %v474_v18 = vsel %vm473_vm0, %v435_v16, %v472_v17 }
 0x134   :  { %v476_v19 = vsel %vm475_vm1, %v474_v18, 0.0 }
 0x135   :  { %477 = vst [vmem:[%s881_s3] sm:$0xff] %v476_v19 }

// kernel: residual_block_3d.9
= control target key start
LH: loop header
LB: loop body
LE: loop exit
PB: predicated region body
PF: predicated region fallthrough
CT: control target
= control target key end

     0   :  { %s535_s0 = inlined_call_operand.vmem [shape: bf16[128,128], index: 0, kind: input, shape index: {}]   ;;  %s536_s1 = inlined_call_operand.vmem [shape: f32[1,128], index: 1, kind: input, shape index: {}]   ;;  %s537_s2 = inlined_call_operand.vmem [shape: f32[1,128], index: 2, kind: input, shape index: {}]   ;;  %s538_s3 = inlined_call_operand.vmem [shape: bf16[128,128], index: 3, kind: input, shape index: {}]   ;;  %s539_s4 = inlined_call_operand.vmem [shape: f32[1,128], index: 4, kind: input, shape index: {}]   ;;  %s540_s5 = inlined_call_operand.vmem [shape: f32[1,128], index: 5, kind: input, shape index: {}]   ;;  %s541_s6 = inlined_call_operand.hbm [shape: f32[128,128], index: 6, kind: output, shape index: {}]  }
   0x1   :  { %v249_v0 = vld [vmem:[%s535_s0] sm:$0xff]   ;;  %v312_v9 = vld [vmem:[%s535_s0 + $0x8] sm:$0xff]   ;;  %v313_v20 = vld [vmem:[%s535_s0 + $0x10] sm:$0xff]  }
   0x2   :  { %v397_v1 = vld [vmem:[%s536_s1] ss:$0 sm:$0xff]  ;;  %v250_v2 = vunpack.c.l.bf16 %v249_v0  ;;  %v251_v5 = vunpack.c.h.bf16 %v249_v0  ;;  %v319_v10 = vld [vmem:[%s538_s3 + $0x8] sm:$0xff]   ;;  %v254_v14 = vunpack.c.l.bf16 %v312_v9  ;;  %v255_v18 = vunpack.c.h.bf16 %v312_v9  ;;  %v320_v21 = vld [vmem:[%s538_s3 + $0x10] sm:$0xff]  }
   0x3   :  { %v281_v3 = vld [vmem:[%s538_s3] sm:$0xff]   ;;  %v286_v15 = vunpack.c.l.bf16 %v319_v10  ;;  %v287_v19 = vunpack.c.h.bf16 %v319_v10 }
   0x4   :  { %v405_v4 = vld [vmem:[%s539_s4] ss:$0 sm:$0xff]  ;;  %v282_v7 = vunpack.c.l.bf16 %v281_v3  ;;  %v283_v8 = vunpack.c.h.bf16 %v281_v3  ;;  %v63_v11 = vmul.f32 %v250_v2, %v397_v1  ;;  %v64_v13 = vmul.f32 %v251_v5, %v397_v1 }
   0x5   :  { %v410_v6 = vld [vmem:[%s537_s2] ss:$0 sm:$0xff]  ;;  %v65_v24 = vmul.f32 %v254_v14, %v397_v1  ;;  %v143_v25 = vmul.f32 %v286_v15, %v405_v4  ;;  %v66_v28 = vmul.f32 %v255_v18, %v397_v1  ;;  %v144_v29 = vmul.f32 %v287_v19, %v405_v4 }
   0x6   :  { %v422_v12 = vld [vmem:[%s540_s5] ss:$0 sm:$0xff]  ;;  %v141_v16 = vmul.f32 %v282_v7, %v405_v4  ;;  %v142_v17 = vmul.f32 %v283_v8, %v405_v4  ;;  %v86_v22 = vadd.f32 %v410_v6, %v63_v11  ;;  %v87_v23 = vadd.f32 %v410_v6, %v64_v13 }
   0x8   :  { %v164_v26 = vadd.f32 %v422_v12, %v141_v16  ;;  %v165_v27 = vadd.f32 %v422_v12, %v142_v17 }
   0x9   :  { %11 = vsyncpa [#allocation3], 0  ;;  %v88_v30 = vadd.f32 %v410_v6, %v65_v24  ;;  %v166_v31 = vadd.f32 %v422_v12, %v143_v25  ;;  %v258_v32 = vunpack.c.l.bf16 %v313_v20  ;;  %v290_v33 = vunpack.c.l.bf16 %v320_v21  ;;  %v314_v42 = vld [vmem:[%s535_s0 + $0x18] sm:$0xff]   ;;  %v315_v52 = vld [vmem:[%s535_s0 + $0x20] sm:$0xff]  }
   0xa   :  { %v180_v34 = vadd.f32 %v164_v26, %v86_v22  ;;  %v181_v35 = vadd.f32 %v165_v27, %v87_v23  ;;  %v89_v36 = vadd.f32 %v410_v6, %v66_v28  ;;  %v167_v37 = vadd.f32 %v422_v12, %v144_v29  ;;  %v321_v43 = vld [vmem:[%s538_s3 + $0x18] sm:$0xff]   ;;  %v322_v57 = vld [vmem:[%s538_s3 + $0x20] sm:$0xff]   ;;  %v316_v14 = vld [vmem:[%s535_s0 + $0x28] sm:$0xff]  }
   0xb   :  { %v182_v38 = vadd.f32 %v166_v31, %v88_v30  ;;  %v67_v39 = vmul.f32 %v258_v32, %v397_v1  ;;  %v145_v40 = vmul.f32 %v290_v33, %v405_v4  ;;  %v259_v41 = vunpack.c.h.bf16 %v313_v20  ;;  %v323_v19 = vld [vmem:[%s538_s3 + $0x28] sm:$0xff]   ;;  %v317_v32 = vld [vmem:[%s535_s0 + $0x30] sm:$0xff]  }
   0xc   :  { %v196_v44 = vmax.f32 %v180_v34, 0.0  ;;  %v197_v45 = vmax.f32 %v181_v35, 0.0  ;;  %v183_v46 = vadd.f32 %v167_v37, %v89_v36  ;;  %v291_v47 = vunpack.c.h.bf16 %v320_v21  ;;  %v324_v33 = vld [vmem:[%s538_s3 + $0x30] sm:$0xff]  }
   0xd   :  { %v198_v48 = vmax.f32 %v182_v38, 0.0  ;;  %v90_v49 = vadd.f32 %v410_v6, %v67_v39  ;;  %v168_v50 = vadd.f32 %v422_v12, %v145_v40  ;;  %v68_v51 = vmul.f32 %v259_v41, %v397_v1 }
   0xe   :  { %212 = vst [vmem:[#allocation2] sm:$0xff] %v196_v44  ;;  %213 = vst [vmem:[#allocation2 + $0x8] sm:$0xff] %v197_v45  ;;  %v199_v53 = vmax.f32 %v183_v46, 0.0  ;;  %v146_v54 = vmul.f32 %v291_v47, %v405_v4  ;;  %v262_v55 = vunpack.c.l.bf16 %v314_v42  ;;  %v294_v56 = vunpack.c.l.bf16 %v321_v43  ;;  %v318_v46 = vld [vmem:[%s535_s0 + $0x38] sm:$0xff]   ;;  %s353_s0 = smov [#allocation2]  }
   0xf   :  { %214 = vst [vmem:[#allocation2 + $0x10] sm:$0xff] %v198_v48  ;;  %v184_v58 = vadd.f32 %v168_v50, %v90_v49  ;;  %v91_v59 = vadd.f32 %v410_v6, %v68_v51  ;;  %v263_v60 = vunpack.c.h.bf16 %v314_v42  ;;  %v295_v61 = vunpack.c.h.bf16 %v321_v43 }
  0x10   :  { %215 = vst [vmem:[#allocation2 + $0x18] sm:$0xff] %v199_v53  ;;  %v169_v62 = vadd.f32 %v422_v12, %v146_v54  ;;  %v69_v63 = vmul.f32 %v262_v55, %v397_v1  ;;  %v147_v0 = vmul.f32 %v294_v56, %v405_v4  ;;  %v266_v2 = vunpack.c.l.bf16 %v315_v52  ;;  %v325_v55 = vld [vmem:[%s538_s3 + $0x38] sm:$0xff]   ;;  %s233_s3 = sshll.u32 %s353_s0, 4  ;;  %s234_s3 = int_to_ptr.vmem [resolvable:$true] %s233_s3 }
  0x11   :  { %v200_v3 = vmax.f32 %v184_v58, 0.0  ;;  %v70_v5 = vmul.f32 %v263_v60, %v397_v1  ;;  %v148_v7 = vmul.f32 %v295_v61, %v405_v4  ;;  %v298_v8 = vunpack.c.l.bf16 %v322_v57  ;;  %s329_s8 = scalar_lea.vmem %s234_s3, 2048  ;;  %p334_p1 = scmp.lt.s32.totalorder %s234_s3, %s234_s3 }
  0x12   :  { %v185_v9 = vadd.f32 %v169_v62, %v91_v59  ;;  %v92_v10 = vadd.f32 %v410_v6, %v69_v63  ;;  %v170_v11 = vadd.f32 %v422_v12, %v147_v0  ;;  %v71_v13 = vmul.f32 %v266_v2, %v397_v1  ;;  %p330_p0 = scmp.ne.s32.totalorder %s234_s3, %s329_s8  ;;  %p335_p2 = scmp.lt.s32.totalorder %s329_s8, %s329_s8 }
  0x13   :  { %216 = vst [vmem:[#allocation2 + $0x20] sm:$0xff] %v200_v3  ;;  %v93_v15 = vadd.f32 %v410_v6, %v70_v5  ;;  %v171_v16 = vadd.f32 %v422_v12, %v148_v7  ;;  %v149_v17 = vmul.f32 %v298_v8, %v405_v4  ;;  %v267_v18 = vunpack.c.h.bf16 %v315_v52 }
  0x14   :  { %v201_v20 = vmax.f32 %v185_v9, 0.0  ;;  %v186_v21 = vadd.f32 %v170_v11, %v92_v10  ;;  %v94_v22 = vadd.f32 %v410_v6, %v71_v13  ;;  %v299_v23 = vunpack.c.h.bf16 %v322_v57  ;;  %p336_p3 = por %p335_p2, %p334_p1 }
  0x15   :  { %v187_v24 = vadd.f32 %v171_v16, %v93_v15  ;;  %v172_v25 = vadd.f32 %v422_v12, %v149_v17  ;;  %v72_v26 = vmul.f32 %v267_v18, %v397_v1  ;;  %v270_v27 = vunpack.c.l.bf16 %v316_v14 }
  0x16   :  { %217 = vst [vmem:[#allocation2 + $0x28] sm:$0xff] %v201_v20  ;;  %v202_v28 = vmax.f32 %v186_v21, 0.0  ;;  %v150_v29 = vmul.f32 %v299_v23, %v405_v4  ;;  %v302_v30 = vunpack.c.l.bf16 %v323_v19  ;;  %v271_v31 = vunpack.c.h.bf16 %v316_v14  ;;  %p337_p4 = pnand %p336_p3, %p330_p0 }
  0x17   :  { %v203_v34 = vmax.f32 %v187_v24, 0.0  ;;  %v188_v35 = vadd.f32 %v172_v25, %v94_v22  ;;  %v95_v36 = vadd.f32 %v410_v6, %v72_v26  ;;  %v73_v37 = vmul.f32 %v270_v27, %v397_v1 }
  0x18   :  { %218 = vst [vmem:[#allocation2 + $0x30] sm:$0xff] %v202_v28  ;;  %v173_v38 = vadd.f32 %v422_v12, %v150_v29  ;;  %v151_v39 = vmul.f32 %v302_v30, %v405_v4  ;;  %v74_v40 = vmul.f32 %v271_v31, %v397_v1  ;;  %v303_v41 = vunpack.c.h.bf16 %v323_v19 }
  0x19   :  { %219 = vst [vmem:[#allocation2 + $0x38] sm:$0xff] %v203_v34  ;;  %v204_v42 = vmax.f32 %v188_v35, 0.0  ;;  %v96_v43 = vadd.f32 %v410_v6, %v73_v37  ;;  %v274_v44 = vunpack.c.l.bf16 %v317_v32  ;;  %v306_v45 = vunpack.c.l.bf16 %v324_v33 }
  0x1a   :  { %v189_v47 = vadd.f32 %v173_v38, %v95_v36  ;;  %v174_v48 = vadd.f32 %v422_v12, %v151_v39  ;;  %v97_v49 = vadd.f32 %v410_v6, %v74_v40  ;;  %v152_v50 = vmul.f32 %v303_v41, %v405_v4 }
  0x1b   :  { %220 = vst [vmem:[#allocation2 + $0x40] sm:$0xff] %v204_v42  ;;  %v75_v51 = vmul.f32 %v274_v44, %v397_v1  ;;  %v153_v52 = vmul.f32 %v306_v45, %v405_v4  ;;  %v275_v53 = vunpack.c.h.bf16 %v317_v32  ;;  %v307_v54 = vunpack.c.h.bf16 %v324_v33 }
  0x1c   :  { %v205_v56 = vmax.f32 %v189_v47, 0.0  ;;  %v190_v57 = vadd.f32 %v174_v48, %v96_v43  ;;  %v175_v58 = vadd.f32 %v422_v12, %v152_v50  ;;  %v278_v59 = vunpack.c.l.bf16 %v318_v46 }
  0x1d   :  { %v98_v60 = vadd.f32 %v410_v6, %v75_v51  ;;  %v176_v61 = vadd.f32 %v422_v12, %v153_v52  ;;  %v76_v62 = vmul.f32 %v275_v53, %v397_v1  ;;  %v154_v63 = vmul.f32 %v307_v54, %v405_v4 }
  0x1e   :  { %221 = vst [vmem:[#allocation2 + $0x48] sm:$0xff] %v205_v56  ;;  %v206_v0 = vmax.f32 %v190_v57, 0.0  ;;  %v191_v2 = vadd.f32 %v175_v58, %v97_v49  ;;  %v77_v3 = vmul.f32 %v278_v59, %v397_v1  ;;  %v310_v5 = vunpack.c.l.bf16 %v325_v55 }
  0x1f   :  { %v192_v7 = vadd.f32 %v176_v61, %v98_v60  ;;  %v99_v8 = vadd.f32 %v410_v6, %v76_v62  ;;  %v177_v9 = vadd.f32 %v422_v12, %v154_v63  ;;  %v279_v10 = vunpack.c.h.bf16 %v318_v46 }
  0x20   :  { %222 = vst [vmem:[#allocation2 + $0x50] sm:$0xff] %v206_v0  ;;  %v207_v11 = vmax.f32 %v191_v2, 0.0  ;;  %v100_v13 = vadd.f32 %v410_v6, %v77_v3  ;;  %v155_v14 = vmul.f32 %v310_v5, %v405_v4  ;;  %v311_v15 = vunpack.c.h.bf16 %v325_v55 }
  0x21   :  { %v208_v16 = vmax.f32 %v192_v7, 0.0  ;;  %v193_v17 = vadd.f32 %v177_v9, %v99_v8  ;;  %v78_v18 = vmul.f32 %v279_v10, %v397_v1 }
  0x22   :  { %223 = vst [vmem:[#allocation2 + $0x58] sm:$0xff] %v207_v11  ;;  %v178_v19 = vadd.f32 %v422_v12, %v155_v14  ;;  %v156_v20 = vmul.f32 %v311_v15, %v405_v4 }
  0x23   :  { %224 = vst [vmem:[#allocation2 + $0x60] sm:$0xff] %v208_v16  ;;  %v209_v21 = vmax.f32 %v193_v17, 0.0  ;;  %v101_v22 = vadd.f32 %v410_v6, %v78_v18 }
  0x24   :  { %v194_v23 = vadd.f32 %v178_v19, %v100_v13  ;;  %v179_v24 = vadd.f32 %v422_v12, %v156_v20 }
  0x25   :  { %225 = vst [vmem:[#allocation2 + $0x68] sm:$0xff] %v209_v21 }
  0x26   :  { %v210_v25 = vmax.f32 %v194_v23, 0.0  ;;  %v195_v26 = vadd.f32 %v179_v24, %v101_v22 }
  0x28   :  { %226 = vst [vmem:[#allocation2 + $0x70] sm:$0xff] %v210_v25  ;;  %v211_v1 = vmax.f32 %v195_v26, 0.0 }
  0x2a   :  { %227 = vst [vmem:[#allocation2 + $0x78] sm:$0xff] %v211_v1 }
  0x2b   :  { %340 = shalt.err (!%p337_p4)
}
  0x2c   :  { %s341_s10 = scalar_lea.hbm %s541_s6, 2048 }
  0x2d   :  { %p342_p5 = scmp.ne.s32.totalorder %s541_s6, %s341_s10  ;;  %p345_p6 = scmp.lt.u32.totalorder %s341_s10, %s541_s6 }
  0x2f   :  { %p347_p7 = pnand %p345_p6, %p342_p5 }
  0x31   :  { %350 = shalt.err (!%p347_p7)
}
  0x32   :  { %s354_s5 = smov 128   ;;  %s355_s14 = smov 8  }
  0x33   :  { %239 = dma.vmem_to_hbm [thread:$0]  %s234_s3, 2048, %s541_s6, [#allocation3], %s354_s5, %s354_s5, %s355_s14  }
  0x34   :  { %351 = dma.done.wait [#allocation3], 2048  }
  0x35   :  { %352 = vsyncadd [#allocation3], 4294965248 }
  0x36   :  { %243 = vsyncpa [#allocation3], 1 }

</bundles_post_ra>
